<compile_context>
chip_gen: v6e
topology: v6e:2x2x1
jax: 0.10.0
libtpu: 0.0.40
codegen_flags: <defaults>
</compile_context>

<pallas_src>
import math

import jax
import jax.numpy as jnp
import numpy as np
from jax.experimental import pallas as pl
from jax.experimental.pallas import tpu as pltpu


def _sigmoid(x):
    return 1.0 / (1.0 + jnp.exp(-x))


# ----------------------------- kernel -------------------------------------- #

def _bigru_kernel(emb_ref, len_ref, h0_ref,
                  wih_f_ref, whh_f_ref, b_f_ref,
                  wih_b_ref, whh_b_ref, b_b_ref,
                  out_ref, hn_ref):
    """One batch tile: full-length bidirectional GRU with length masking.

    emb_ref : (L, TB, H)  bf16   embedded tokens (seq-major)
    len_ref : (TB, 1)     int32  sequence lengths
    h0_ref  : (2, TB, H)  f32    initial hidden (fwd, bwd)
    w*_ref  : (3, H, H)          gate-stacked, pre-transposed weights (r, z, n)
    b*_ref  : (4, H)      f32    [b_ir+b_hr, b_iz+b_hz, b_in, b_hn]
    out_ref : (L, TB, H)  f32    summed fwd+bwd outputs
    hn_ref  : (2, TB, H)  f32    final hidden per direction
    """
    L = out_ref.shape[0]
    lengths = len_ref[...]                        # (TB, 1) int32
    hn_ref[...] = h0_ref[...].astype(jnp.float32)

    def run_direction(wih_ref, whh_ref, b_ref, dir_idx, reverse):
        # Hoist weight/bias loads out of the time loop (loop-invariant).
        w_ir, w_iz, w_in = wih_ref[0], wih_ref[1], wih_ref[2]   # (H, H) bf16
        w_hr, w_hz, w_hn = whh_ref[0], whh_ref[1], whh_ref[2]   # (H, H) f32
        b = b_ref[...]                                          # (4, H)
        b_r, b_z, b_in, b_hn = b[0:1], b[1:2], b[2:3], b[3:4]   # (1, H) each

        @pl.loop(0, L)
        def _(s):
            t = (L - 1 - s) if reverse else s
            x_t = emb_ref[t]                      # (TB, H) bf16
            h = hn_ref[dir_idx]                   # (TB, H) f32 (carried in VMEM)

            gi_r = jnp.dot(x_t, w_ir, preferred_element_type=jnp.float32)
            gi_z = jnp.dot(x_t, w_iz, preferred_element_type=jnp.float32)
            gi_n = jnp.dot(x_t, w_in, preferred_element_type=jnp.float32)
            gh_r = jnp.dot(h, w_hr, preferred_element_type=jnp.float32)
            gh_z = jnp.dot(h, w_hz, preferred_element_type=jnp.float32)
            gh_n = jnp.dot(h, w_hn, preferred_element_type=jnp.float32)

            r = _sigmoid(gi_r + gh_r + b_r)
            z = _sigmoid(gi_z + gh_z + b_z)
            n = jnp.tanh(gi_n + b_in + r * (gh_n + b_hn))
            h_new = (1.0 - z) * n + z * h

            # packed-sequence semantics: freeze state / zero output past length
            m = (lengths > t).astype(jnp.float32)          # (TB, 1)
            hn_ref[dir_idx] = m * h_new + (1.0 - m) * h
            contrib = (m * h_new).astype(out_ref.dtype)
            if reverse:
                out_ref[t] = out_ref[t] + contrib          # accumulate bwd half
            else:
                out_ref[t] = contrib                       # write fwd half

    run_direction(wih_f_ref, whh_f_ref, b_f_ref, 0, reverse=False)
    run_direction(wih_b_ref, whh_b_ref, b_b_ref, 1, reverse=True)


# ----------------------------- module wrapper ------------------------------ #

def _pick_batch_tile(B):
    for tb in (64, 32, 16, 8):
        if B % tb == 0:
            return tb
    return B


class EncoderRNN:
    """JAX/Pallas port of the chatbot EncoderRNN (1-layer bidirectional GRU)."""

    def __init__(self, hidden_size, embedding, n_layers=1, dropout=0.0, *, key):
        if n_layers != 1:
            # TODO(synk): stacked (n_layers > 1) bi-GRU with inter-layer dropout
            # is not implemented; the spec's default/forward path uses 1 layer.
            raise NotImplementedError("n_layers > 1 not supported")
        self.hidden_size = hidden_size
        self.n_layers = n_layers
        self.embedding = jnp.asarray(embedding, jnp.float32)       # (V, H)

        H = hidden_size
        k = 1.0 / math.sqrt(H)
        keys = jax.random.split(key, 8)

        def u(kk, shape):
            return jax.random.uniform(kk, shape, jnp.float32, -k, k)

        self.params = {}
        for d, off in (("fwd", 0), ("bwd", 4)):
            self.params[d] = dict(
                W_ih=u(keys[off + 0], (3 * H, H)),
                W_hh=u(keys[off + 1], (3 * H, H)),
                b_ih=u(keys[off + 2], (3 * H,)),
                b_hh=u(keys[off + 3], (3 * H,)),
            )

    def _kernel_weights(self, d):
        H = self.hidden_size
        p = self.params[d]
        wih = jnp.stack([p["W_ih"][g * H:(g + 1) * H].T for g in range(3)])
        whh = jnp.stack([p["W_hh"][g * H:(g + 1) * H].T for g in range(3)])
        b = jnp.stack([
            p["b_ih"][0:H] + p["b_hh"][0:H],           # b_r  (softmax-free, exact)
            p["b_ih"][H:2 * H] + p["b_hh"][H:2 * H],   # b_z
            p["b_ih"][2 * H:3 * H],                    # b_in
            p["b_hh"][2 * H:3 * H],                    # b_hn
        ])
        return wih.astype(jnp.bfloat16), whh, b

    def __call__(self, input_seq, input_lengths, hidden=None):
        """input_seq: (L, B) int32; input_lengths: (B,) -> (outputs, hidden)."""
        L, B = input_seq.shape
        H = self.hidden_size

        # TODO(synk): embedding gather left to XLA (data-dependent row gather
        # has no clean BlockSpec form); the GRU itself is fully in-kernel.
        embedded = jnp.take(self.embedding, input_seq, axis=0)       # (L, B, H)
        emb = embedded.astype(jnp.bfloat16)                          # halve HBM bytes
        lengths = jnp.asarray(input_lengths, jnp.int32).reshape(B, 1)
        if hidden is None:
            h0 = jnp.zeros((2, B, H), jnp.float32)
        else:
            h0 = jnp.asarray(hidden, jnp.float32)

        wih_f, whh_f, b_f = self._kernel_weights("fwd")
        wih_b, whh_b, b_b = self._kernel_weights("bwd")

        TB = _pick_batch_tile(B)
        grid = (B // TB,)
        batch_map3 = lambda i: (0, i, 0)
        const_map3 = lambda i: (0, 0, 0)
        const_map2 = lambda i: (0, 0)

        outputs, hidden_out = pl.pallas_call(
            _bigru_kernel,
            out_shape=(jax.ShapeDtypeStruct((L, B, H), jnp.float32),
                       jax.ShapeDtypeStruct((2, B, H), jnp.float32)),
            grid=grid,
            in_specs=[
                pl.BlockSpec((L, TB, H), batch_map3),          # embedded (bf16)
                pl.BlockSpec((TB, 1), lambda i: (i, 0)),       # lengths
                pl.BlockSpec((2, TB, H), batch_map3),          # h0
                pl.BlockSpec((3, H, H), const_map3),           # W_ih fwd (bf16)
                pl.BlockSpec((3, H, H), const_map3),           # W_hh fwd
                pl.BlockSpec((4, H), const_map2),              # biases fwd
                pl.BlockSpec((3, H, H), const_map3),           # W_ih bwd (bf16)
                pl.BlockSpec((3, H, H), const_map3),           # W_hh bwd
                pl.BlockSpec((4, H), const_map2),              # biases bwd
            ],
            out_specs=(
                pl.BlockSpec((L, TB, H), batch_map3),          # summed outputs
                pl.BlockSpec((2, TB, H), batch_map3),          # final hidden
            ),
            compiler_params=pltpu.CompilerParams(
                dimension_semantics=("parallel",)),            # v7x: 2 TCs split batch tiles
        )(emb, lengths, h0, wih_f, whh_f, b_f, wih_b, whh_b, b_b)
        return outputs, hidden_out


# ----------------------------- pure-JAX reference -------------------------- #

def _ref_gru_direction(emb, lengths, h0, p, reverse):
    L, B, H = emb.shape
    W_ih, W_hh, b_ih, b_hh = p["W_ih"], p["W_hh"], p["b_ih"], p["b_hh"]
    h = h0
    outs = [None] * L
    order = range(L - 1, -1, -1) if reverse else range(L)
    for t in order:
        x = emb[t]
        gi = x @ W_ih.T + b_ih
        gh = h @ W_hh.T + b_hh
        r = jax.nn.sigmoid(gi[:, :H] + gh[:, :H])
        z = jax.nn.sigmoid(gi[:, H:2 * H] + gh[:, H:2 * H])
        n = jnp.tanh(gi[:, 2 * H:] + r * gh[:, 2 * H:])
        h_new = (1.0 - z) * n + z * h
        valid = (lengths > t)[:, None]
        h = jnp.where(valid, h_new, h)
        outs[t] = jnp.where(valid, h_new, 0.0)
    return jnp.stack(outs), h


def ref_encoder_forward(enc, input_seq, input_lengths, hidden=None):
    L, B = input_seq.shape
    H = enc.hidden_size
    emb = jnp.take(enc.embedding, input_seq, axis=0)
    # Match the kernel's bf16 activation/W_ih streams (apples-to-apples precision).
    emb = emb.astype(jnp.bfloat16).astype(jnp.float32)
    lengths = jnp.asarray(input_lengths, jnp.int32)
    h0 = jnp.zeros((2, B, H), jnp.float32) if hidden is None else jnp.asarray(hidden, jnp.float32)

    def cast_p(p):
        q = dict(p)
        q["W_ih"] = p["W_ih"].astype(jnp.bfloat16).astype(jnp.float32)
        return q

    out_f, h_f = _ref_gru_direction(emb, lengths, h0[0], cast_p(enc.params["fwd"]), False)
    out_b, h_b = _ref_gru_direction(emb, lengths, h0[1], cast_p(enc.params["bwd"]), True)
    return out_f + out_b, jnp.stack([h_f, h_b])


# ----------------------------- main ----------------------------------------- #

if __name__ == "__main__":
    L, B, H, V = 8, 4, 32, 20     # small shapes; original uses hidden_size=500
    key = jax.random.PRNGKey(0)
    k_emb, k_tok, k_par = jax.random.split(key, 3)

    embedding_table = jax.random.normal(k_emb, (V, H), jnp.float32)
    input_seq = jax.random.randint(k_tok, (L, B), 0, V, jnp.int32)     # (L, B) tokens
    input_lengths = jnp.array([8, 6, 5, 3], jnp.int32)                 # sorted desc

    enc = EncoderRNN(H, embedding_table, n_layers=1, dropout=0.1, key=k_par)

    outputs, hidden = enc(input_seq, input_lengths)
    outputs, hidden = jax.block_until_ready((outputs, hidden))

    ref_out, ref_hid = ref_encoder_forward(enc, input_seq, input_lengths)

    assert outputs.shape == (L, B, H), outputs.shape
    assert hidden.shape == (2, B, H), hidden.shape
    np.testing.assert_allclose(np.asarray(outputs), np.asarray(ref_out),
                               rtol=1e-3, atol=1e-3)
    np.testing.assert_allclose(np.asarray(hidden), np.asarray(ref_hid),
                               rtol=1e-3, atol=1e-3)

    print("KERNEL_OK")
</pallas_src>

<mosaic_0001>
module attributes {stable_mosaic.version = 11 : i64} {
  func.func @_bigru_kernel(%arg0: i32, %arg1: memref<8x4x32xbf16, #tpu.memory_space<vmem>>, %arg2: memref<4x1xi32, #tpu.memory_space<vmem>>, %arg3: memref<2x4x32xf32, #tpu.memory_space<vmem>>, %arg4: memref<3x32x32xbf16, #tpu.memory_space<vmem>>, %arg5: memref<3x32x32xf32, #tpu.memory_space<vmem>>, %arg6: memref<4x32xf32, #tpu.memory_space<vmem>>, %arg7: memref<3x32x32xbf16, #tpu.memory_space<vmem>>, %arg8: memref<3x32x32xf32, #tpu.memory_space<vmem>>, %arg9: memref<4x32xf32, #tpu.memory_space<vmem>>, %arg10: memref<8x4x32xf32, #tpu.memory_space<vmem>>, %arg11: memref<2x4x32xf32, #tpu.memory_space<vmem>>) attributes {dimension_semantics = [#tpu.dimension_semantics<parallel>], iteration_bounds = array<i64: 1>, scalar_prefetch = 0 : i64, scratch_operands = 0 : i64, tpu.core_type = #tpu.core_type<tc>, window_params = [{transform_indices = @transform_0, window_bounds = array<i64: 8, 4, 32>}, {transform_indices = @transform_1, window_bounds = array<i64: 4, 1>}, {transform_indices = @transform_2, window_bounds = array<i64: 2, 4, 32>}, {pipeline_mode = #tpu.pipeline_mode<synchronous>, transform_indices = @transform_3, window_bounds = array<i64: 3, 32, 32>}, {pipeline_mode = #tpu.pipeline_mode<synchronous>, transform_indices = @transform_4, window_bounds = array<i64: 3, 32, 32>}, {pipeline_mode = #tpu.pipeline_mode<synchronous>, transform_indices = @transform_5, window_bounds = array<i64: 4, 32>}, {pipeline_mode = #tpu.pipeline_mode<synchronous>, transform_indices = @transform_6, window_bounds = array<i64: 3, 32, 32>}, {pipeline_mode = #tpu.pipeline_mode<synchronous>, transform_indices = @transform_7, window_bounds = array<i64: 3, 32, 32>}, {pipeline_mode = #tpu.pipeline_mode<synchronous>, transform_indices = @transform_8, window_bounds = array<i64: 4, 32>}, {transform_indices = @transform_9, window_bounds = array<i64: 8, 4, 32>}, {transform_indices = @transform_10, window_bounds = array<i64: 2, 4, 32>}]} {
    %c0 = arith.constant 0 : index
    %c0_0 = arith.constant 0 : index
    %0 = vector.load %arg2[%c0, %c0_0] : memref<4x1xi32, #tpu.memory_space<vmem>>, vector<4x1xi32>
    %c0_1 = arith.constant 0 : index
    %c0_2 = arith.constant 0 : index
    %c0_3 = arith.constant 0 : index
    %1 = vector.load %arg3[%c0_1, %c0_2, %c0_3] : memref<2x4x32xf32, #tpu.memory_space<vmem>>, vector<2x4x32xf32>
    %c0_4 = arith.constant 0 : index
    %c0_5 = arith.constant 0 : index
    %c0_6 = arith.constant 0 : index
    %2 = vector.load %arg11[%c0_4, %c0_5, %c0_6] : memref<2x4x32xf32, #tpu.memory_space<vmem>>, vector<2x4x32xf32>
    tpu.vector_store %arg11[%c0_4, %c0_5, %c0_6], %1 {strides = array<i32>} : memref<2x4x32xf32, #tpu.memory_space<vmem>>, vector<2x4x32xf32>,
    %c0_7 = arith.constant 0 : index
    %c0_8 = arith.constant 0 : index
    %c0_9 = arith.constant 0 : index
    %3 = vector.load %arg4[%c0_7, %c0_8, %c0_9] : memref<3x32x32xbf16, #tpu.memory_space<vmem>>, vector<1x32x32xbf16>
    %4 = vector.shape_cast %3 : vector<1x32x32xbf16> to vector<32x32xbf16>
    %c1 = arith.constant 1 : index
    %c0_10 = arith.constant 0 : index
    %c0_11 = arith.constant 0 : index
    %5 = vector.load %arg4[%c1, %c0_10, %c0_11] : memref<3x32x32xbf16, #tpu.memory_space<vmem>>, vector<1x32x32xbf16>
    %6 = vector.shape_cast %5 : vector<1x32x32xbf16> to vector<32x32xbf16>
    %c2 = arith.constant 2 : index
    %c0_12 = arith.constant 0 : index
    %c0_13 = arith.constant 0 : index
    %7 = vector.load %arg4[%c2, %c0_12, %c0_13] : memref<3x32x32xbf16, #tpu.memory_space<vmem>>, vector<1x32x32xbf16>
    %8 = vector.shape_cast %7 : vector<1x32x32xbf16> to vector<32x32xbf16>
    %c0_14 = arith.constant 0 : index
    %c0_15 = arith.constant 0 : index
    %c0_16 = arith.constant 0 : index
    %9 = vector.load %arg5[%c0_14, %c0_15, %c0_16] : memref<3x32x32xf32, #tpu.memory_space<vmem>>, vector<1x32x32xf32>
    %10 = vector.shape_cast %9 : vector<1x32x32xf32> to vector<32x32xf32>
    %c1_17 = arith.constant 1 : index
    %c0_18 = arith.constant 0 : index
    %c0_19 = arith.constant 0 : index
    %11 = vector.load %arg5[%c1_17, %c0_18, %c0_19] : memref<3x32x32xf32, #tpu.memory_space<vmem>>, vector<1x32x32xf32>
    %12 = vector.shape_cast %11 : vector<1x32x32xf32> to vector<32x32xf32>
    %c2_20 = arith.constant 2 : index
    %c0_21 = arith.constant 0 : index
    %c0_22 = arith.constant 0 : index
    %13 = vector.load %arg5[%c2_20, %c0_21, %c0_22] : memref<3x32x32xf32, #tpu.memory_space<vmem>>, vector<1x32x32xf32>
    %14 = vector.shape_cast %13 : vector<1x32x32xf32> to vector<32x32xf32>
    %c0_23 = arith.constant 0 : index
    %c0_24 = arith.constant 0 : index
    %15 = vector.load %arg6[%c0_23, %c0_24] : memref<4x32xf32, #tpu.memory_space<vmem>>, vector<4x32xf32>
    %16 = vector.extract_strided_slice %15 {offsets = [0, 0], sizes = [1, 32], strides = [1, 1]} : vector<4x32xf32> to vector<1x32xf32>
    %17 = vector.extract_strided_slice %15 {offsets = [1, 0], sizes = [1, 32], strides = [1, 1]} : vector<4x32xf32> to vector<1x32xf32>
    %18 = vector.extract_strided_slice %15 {offsets = [2, 0], sizes = [1, 32], strides = [1, 1]} : vector<4x32xf32> to vector<1x32xf32>
    %19 = vector.extract_strided_slice %15 {offsets = [3, 0], sizes = [1, 32], strides = [1, 1]} : vector<4x32xf32> to vector<1x32xf32>
    %c0_i32 = arith.constant 0 : i32
    %c8_i32 = arith.constant 8 : i32
    %20 = arith.addi %c0_i32, %c8_i32 : i32
    %c1_i32 = arith.constant 1 : i32
    scf.for %arg12 = %c0_i32 to %20 step %c1_i32  : i32 {
      %c1_i32_50 = arith.constant 1 : i32
      %39 = arith.muli %arg12, %c1_i32_50 : i32
      %c0_i32_51 = arith.constant 0 : i32
      %40 = arith.addi %c0_i32_51, %39 : i32
      %41 = arith.index_cast %40 : i32 to index
      %c0_52 = arith.constant 0 : index
      %c0_53 = arith.constant 0 : index
      %42 = vector.load %arg1[%41, %c0_52, %c0_53] : memref<8x4x32xbf16, #tpu.memory_space<vmem>>, vector<1x4x32xbf16>
      %43 = vector.shape_cast %42 : vector<1x4x32xbf16> to vector<4x32xbf16>
      %c0_54 = arith.constant 0 : index
      %c0_55 = arith.constant 0 : index
      %c0_56 = arith.constant 0 : index
      %44 = vector.load %arg11[%c0_54, %c0_55, %c0_56] : memref<2x4x32xf32, #tpu.memory_space<vmem>>, vector<1x4x32xf32>
      %45 = vector.shape_cast %44 : vector<1x4x32xf32> to vector<4x32xf32>
      %cst = arith.constant dense<0.000000e+00> : vector<4x32xf32>
      %46 = tpu.matmul %43, %4, %cst {dimension_numbers = #tpu.dot_dimension_numbers<[1], [0], [0], [1], [0, 0, 1, 1], [], []>} : vector<4x32xbf16>, vector<32x32xbf16>, vector<4x32xf32> -> vector<4x32xf32>
      %cst_57 = arith.constant dense<0.000000e+00> : vector<4x32xf32>
      %47 = tpu.matmul %43, %6, %cst_57 {dimension_numbers = #tpu.dot_dimension_numbers<[1], [0], [0], [1], [0, 0, 1, 1], [], []>} : vector<4x32xbf16>, vector<32x32xbf16>, vector<4x32xf32> -> vector<4x32xf32>
      %cst_58 = arith.constant dense<0.000000e+00> : vector<4x32xf32>
      %48 = tpu.matmul %43, %8, %cst_58 {dimension_numbers = #tpu.dot_dimension_numbers<[1], [0], [0], [1], [0, 0, 1, 1], [], []>} : vector<4x32xbf16>, vector<32x32xbf16>, vector<4x32xf32> -> vector<4x32xf32>
      %cst_59 = arith.constant dense<0.000000e+00> : vector<4x32xf32>
      %49 = tpu.matmul %45, %10, %cst_59 {dimension_numbers = #tpu.dot_dimension_numbers<[1], [0], [0], [1], [0, 0, 1, 1], [], []>} : vector<4x32xf32>, vector<32x32xf32>, vector<4x32xf32> -> vector<4x32xf32>
      %cst_60 = arith.constant dense<0.000000e+00> : vector<4x32xf32>
      %50 = tpu.matmul %45, %12, %cst_60 {dimension_numbers = #tpu.dot_dimension_numbers<[1], [0], [0], [1], [0, 0, 1, 1], [], []>} : vector<4x32xf32>, vector<32x32xf32>, vector<4x32xf32> -> vector<4x32xf32>
      %cst_61 = arith.constant dense<0.000000e+00> : vector<4x32xf32>
      %51 = tpu.matmul %45, %14, %cst_61 {dimension_numbers = #tpu.dot_dimension_numbers<[1], [0], [0], [1], [0, 0, 1, 1], [], []>} : vector<4x32xf32>, vector<32x32xf32>, vector<4x32xf32> -> vector<4x32xf32>
      %52 = arith.addf %46, %49 : vector<4x32xf32>
      %53 = vector.broadcast %16 : vector<1x32xf32> to vector<4x32xf32>
      %54 = arith.addf %52, %53 : vector<4x32xf32>
      %cst_62 = arith.constant 0.000000e+00 : f32
      %55 = vector.broadcast %cst_62 : f32 to vector<4x32xf32>
      %56 = arith.subf %55, %54 : vector<4x32xf32>
      %57 = math.exp %56 : vector<4x32xf32>
      %cst_63 = arith.constant 1.000000e+00 : f32
      %58 = vector.broadcast %cst_63 : f32 to vector<4x32xf32>
      %59 = arith.addf %58, %57 : vector<4x32xf32>
      %cst_64 = arith.constant 1.000000e+00 : f32
      %60 = vector.broadcast %cst_64 : f32 to vector<4x32xf32>
      %61 = arith.divf %60, %59 : vector<4x32xf32>
      %62 = arith.addf %47, %50 : vector<4x32xf32>
      %63 = vector.broadcast %17 : vector<1x32xf32> to vector<4x32xf32>
      %64 = arith.addf %62, %63 : vector<4x32xf32>
      %cst_65 = arith.constant 0.000000e+00 : f32
      %65 = vector.broadcast %cst_65 : f32 to vector<4x32xf32>
      %66 = arith.subf %65, %64 : vector<4x32xf32>
      %67 = math.exp %66 : vector<4x32xf32>
      %cst_66 = arith.constant 1.000000e+00 : f32
      %68 = vector.broadcast %cst_66 : f32 to vector<4x32xf32>
      %69 = arith.addf %68, %67 : vector<4x32xf32>
      %cst_67 = arith.constant 1.000000e+00 : f32
      %70 = vector.broadcast %cst_67 : f32 to vector<4x32xf32>
      %71 = arith.divf %70, %69 : vector<4x32xf32>
      %72 = vector.broadcast %18 : vector<1x32xf32> to vector<4x32xf32>
      %73 = arith.addf %48, %72 : vector<4x32xf32>
      %74 = vector.broadcast %19 : vector<1x32xf32> to vector<4x32xf32>
      %75 = arith.addf %51, %74 : vector<4x32xf32>
      %76 = arith.mulf %61, %75 : vector<4x32xf32>
      %77 = arith.addf %73, %76 : vector<4x32xf32>
      %78 = math.tanh %77 : vector<4x32xf32>
      %cst_68 = arith.constant 1.000000e+00 : f32
      %79 = vector.broadcast %cst_68 : f32 to vector<4x32xf32>
      %80 = arith.subf %79, %71 : vector<4x32xf32>
      %81 = arith.mulf %80, %78 : vector<4x32xf32>
      %82 = arith.mulf %71, %45 : vector<4x32xf32>
      %83 = arith.addf %81, %82 : vector<4x32xf32>
      %84 = vector.broadcast %40 : i32 to vector<4x1xi32>
      %85 = arith.cmpi sgt, %0, %84 : vector<4x1xi32>
      %86 = arith.extui %85 : vector<4x1xi1> to vector<4x1xi32>
      %87 = arith.sitofp %86 : vector<4x1xi32> to vector<4x1xf32>
      %88 = vector.broadcast %87 : vector<4x1xf32> to vector<4x32xf32>
      %89 = arith.mulf %88, %83 : vector<4x32xf32>
      %cst_69 = arith.constant 1.000000e+00 : f32
      %90 = vector.broadcast %cst_69 : f32 to vector<4x1xf32>
      %91 = arith.subf %90, %87 : vector<4x1xf32>
      %92 = vector.broadcast %91 : vector<4x1xf32> to vector<4x32xf32>
      %93 = arith.mulf %92, %45 : vector<4x32xf32>
      %94 = arith.addf %89, %93 : vector<4x32xf32>
      %c0_70 = arith.constant 0 : index
      %c0_71 = arith.constant 0 : index
      %c0_72 = arith.constant 0 : index
      %95 = vector.load %arg11[%c0_70, %c0_71, %c0_72] : memref<2x4x32xf32, #tpu.memory_space<vmem>>, vector<1x4x32xf32>
      %96 = vector.shape_cast %95 : vector<1x4x32xf32> to vector<4x32xf32>
      %97 = vector.shape_cast %94 : vector<4x32xf32> to vector<1x4x32xf32>
      tpu.vector_store %arg11[%c0_70, %c0_71, %c0_72], %97 {strides = array<i32>} : memref<2x4x32xf32, #tpu.memory_space<vmem>>, vector<1x4x32xf32>,
      %98 = vector.broadcast %87 : vector<4x1xf32> to vector<4x32xf32>
      %99 = arith.mulf %98, %83 : vector<4x32xf32>
      %100 = arith.index_cast %40 : i32 to index
      %c0_73 = arith.constant 0 : index
      %c0_74 = arith.constant 0 : index
      %101 = vector.load %arg10[%100, %c0_73, %c0_74] : memref<8x4x32xf32, #tpu.memory_space<vmem>>, vector<1x4x32xf32>
      %102 = vector.shape_cast %101 : vector<1x4x32xf32> to vector<4x32xf32>
      %103 = vector.shape_cast %99 : vector<4x32xf32> to vector<1x4x32xf32>
      tpu.vector_store %arg10[%100, %c0_73, %c0_74], %103 {strides = array<i32>} : memref<8x4x32xf32, #tpu.memory_space<vmem>>, vector<1x4x32xf32>,
    }
    %c8_i32_25 = arith.constant 8 : i32
    %c0_26 = arith.constant 0 : index
    %c0_27 = arith.constant 0 : index
    %c0_28 = arith.constant 0 : index
    %21 = vector.load %arg7[%c0_26, %c0_27, %c0_28] : memref<3x32x32xbf16, #tpu.memory_space<vmem>>, vector<1x32x32xbf16>
    %22 = vector.shape_cast %21 : vector<1x32x32xbf16> to vector<32x32xbf16>
    %c1_29 = arith.constant 1 : index
    %c0_30 = arith.constant 0 : index
    %c0_31 = arith.constant 0 : index
    %23 = vector.load %arg7[%c1_29, %c0_30, %c0_31] : memref<3x32x32xbf16, #tpu.memory_space<vmem>>, vector<1x32x32xbf16>
    %24 = vector.shape_cast %23 : vector<1x32x32xbf16> to vector<32x32xbf16>
    %c2_32 = arith.constant 2 : index
    %c0_33 = arith.constant 0 : index
    %c0_34 = arith.constant 0 : index
    %25 = vector.load %arg7[%c2_32, %c0_33, %c0_34] : memref<3x32x32xbf16, #tpu.memory_space<vmem>>, vector<1x32x32xbf16>
    %26 = vector.shape_cast %25 : vector<1x32x32xbf16> to vector<32x32xbf16>
    %c0_35 = arith.constant 0 : index
    %c0_36 = arith.constant 0 : index
    %c0_37 = arith.constant 0 : index
    %27 = vector.load %arg8[%c0_35, %c0_36, %c0_37] : memref<3x32x32xf32, #tpu.memory_space<vmem>>, vector<1x32x32xf32>
    %28 = vector.shape_cast %27 : vector<1x32x32xf32> to vector<32x32xf32>
    %c1_38 = arith.constant 1 : index
    %c0_39 = arith.constant 0 : index
    %c0_40 = arith.constant 0 : index
    %29 = vector.load %arg8[%c1_38, %c0_39, %c0_40] : memref<3x32x32xf32, #tpu.memory_space<vmem>>, vector<1x32x32xf32>
    %30 = vector.shape_cast %29 : vector<1x32x32xf32> to vector<32x32xf32>
    %c2_41 = arith.constant 2 : index
    %c0_42 = arith.constant 0 : index
    %c0_43 = arith.constant 0 : index
    %31 = vector.load %arg8[%c2_41, %c0_42, %c0_43] : memref<3x32x32xf32, #tpu.memory_space<vmem>>, vector<1x32x32xf32>
    %32 = vector.shape_cast %31 : vector<1x32x32xf32> to vector<32x32xf32>
    %c0_44 = arith.constant 0 : index
    %c0_45 = arith.constant 0 : index
    %33 = vector.load %arg9[%c0_44, %c0_45] : memref<4x32xf32, #tpu.memory_space<vmem>>, vector<4x32xf32>
    %34 = vector.extract_strided_slice %33 {offsets = [0, 0], sizes = [1, 32], strides = [1, 1]} : vector<4x32xf32> to vector<1x32xf32>
    %35 = vector.extract_strided_slice %33 {offsets = [1, 0], sizes = [1, 32], strides = [1, 1]} : vector<4x32xf32> to vector<1x32xf32>
    %36 = vector.extract_strided_slice %33 {offsets = [2, 0], sizes = [1, 32], strides = [1, 1]} : vector<4x32xf32> to vector<1x32xf32>
    %37 = vector.extract_strided_slice %33 {offsets = [3, 0], sizes = [1, 32], strides = [1, 1]} : vector<4x32xf32> to vector<1x32xf32>
    %c0_i32_46 = arith.constant 0 : i32
    %c8_i32_47 = arith.constant 8 : i32
    %38 = arith.addi %c0_i32_46, %c8_i32_47 : i32
    %c1_i32_48 = arith.constant 1 : i32
    scf.for %arg12 = %c0_i32_46 to %38 step %c1_i32_48  : i32 {
      %c1_i32_50 = arith.constant 1 : i32
      %39 = arith.muli %arg12, %c1_i32_50 : i32
      %c0_i32_51 = arith.constant 0 : i32
      %40 = arith.addi %c0_i32_51, %39 : i32
      %c7_i32 = arith.constant 7 : i32
      %41 = arith.subi %c7_i32, %40 : i32
      %42 = arith.index_cast %41 : i32 to index
      %c0_52 = arith.constant 0 : index
      %c0_53 = arith.constant 0 : index
      %43 = vector.load %arg1[%42, %c0_52, %c0_53] : memref<8x4x32xbf16, #tpu.memory_space<vmem>>, vector<1x4x32xbf16>
      %44 = vector.shape_cast %43 : vector<1x4x32xbf16> to vector<4x32xbf16>
      %c1_54 = arith.constant 1 : index
      %c0_55 = arith.constant 0 : index
      %c0_56 = arith.constant 0 : index
      %45 = vector.load %arg11[%c1_54, %c0_55, %c0_56] : memref<2x4x32xf32, #tpu.memory_space<vmem>>, vector<1x4x32xf32>
      %46 = vector.shape_cast %45 : vector<1x4x32xf32> to vector<4x32xf32>
      %cst = arith.constant dense<0.000000e+00> : vector<4x32xf32>
      %47 = tpu.matmul %44, %22, %cst {dimension_numbers = #tpu.dot_dimension_numbers<[1], [0], [0], [1], [0, 0, 1, 1], [], []>} : vector<4x32xbf16>, vector<32x32xbf16>, vector<4x32xf32> -> vector<4x32xf32>
      %cst_57 = arith.constant dense<0.000000e+00> : vector<4x32xf32>
      %48 = tpu.matmul %44, %24, %cst_57 {dimension_numbers = #tpu.dot_dimension_numbers<[1], [0], [0], [1], [0, 0, 1, 1], [], []>} : vector<4x32xbf16>, vector<32x32xbf16>, vector<4x32xf32> -> vector<4x32xf32>
      %cst_58 = arith.constant dense<0.000000e+00> : vector<4x32xf32>
      %49 = tpu.matmul %44, %26, %cst_58 {dimension_numbers = #tpu.dot_dimension_numbers<[1], [0], [0], [1], [0, 0, 1, 1], [], []>} : vector<4x32xbf16>, vector<32x32xbf16>, vector<4x32xf32> -> vector<4x32xf32>
      %cst_59 = arith.constant dense<0.000000e+00> : vector<4x32xf32>
      %50 = tpu.matmul %46, %28, %cst_59 {dimension_numbers = #tpu.dot_dimension_numbers<[1], [0], [0], [1], [0, 0, 1, 1], [], []>} : vector<4x32xf32>, vector<32x32xf32>, vector<4x32xf32> -> vector<4x32xf32>
      %cst_60 = arith.constant dense<0.000000e+00> : vector<4x32xf32>
      %51 = tpu.matmul %46, %30, %cst_60 {dimension_numbers = #tpu.dot_dimension_numbers<[1], [0], [0], [1], [0, 0, 1, 1], [], []>} : vector<4x32xf32>, vector<32x32xf32>, vector<4x32xf32> -> vector<4x32xf32>
      %cst_61 = arith.constant dense<0.000000e+00> : vector<4x32xf32>
      %52 = tpu.matmul %46, %32, %cst_61 {dimension_numbers = #tpu.dot_dimension_numbers<[1], [0], [0], [1], [0, 0, 1, 1], [], []>} : vector<4x32xf32>, vector<32x32xf32>, vector<4x32xf32> -> vector<4x32xf32>
      %53 = arith.addf %47, %50 : vector<4x32xf32>
      %54 = vector.broadcast %34 : vector<1x32xf32> to vector<4x32xf32>
      %55 = arith.addf %53, %54 : vector<4x32xf32>
      %cst_62 = arith.constant 0.000000e+00 : f32
      %56 = vector.broadcast %cst_62 : f32 to vector<4x32xf32>
      %57 = arith.subf %56, %55 : vector<4x32xf32>
      %58 = math.exp %57 : vector<4x32xf32>
      %cst_63 = arith.constant 1.000000e+00 : f32
      %59 = vector.broadcast %cst_63 : f32 to vector<4x32xf32>
      %60 = arith.addf %59, %58 : vector<4x32xf32>
      %cst_64 = arith.constant 1.000000e+00 : f32
      %61 = vector.broadcast %cst_64 : f32 to vector<4x32xf32>
      %62 = arith.divf %61, %60 : vector<4x32xf32>
      %63 = arith.addf %48, %51 : vector<4x32xf32>
      %64 = vector.broadcast %35 : vector<1x32xf32> to vector<4x32xf32>
      %65 = arith.addf %63, %64 : vector<4x32xf32>
      %cst_65 = arith.constant 0.000000e+00 : f32
      %66 = vector.broadcast %cst_65 : f32 to vector<4x32xf32>
      %67 = arith.subf %66, %65 : vector<4x32xf32>
      %68 = math.exp %67 : vector<4x32xf32>
      %cst_66 = arith.constant 1.000000e+00 : f32
      %69 = vector.broadcast %cst_66 : f32 to vector<4x32xf32>
      %70 = arith.addf %69, %68 : vector<4x32xf32>
      %cst_67 = arith.constant 1.000000e+00 : f32
      %71 = vector.broadcast %cst_67 : f32 to vector<4x32xf32>
      %72 = arith.divf %71, %70 : vector<4x32xf32>
      %73 = vector.broadcast %36 : vector<1x32xf32> to vector<4x32xf32>
      %74 = arith.addf %49, %73 : vector<4x32xf32>
      %75 = vector.broadcast %37 : vector<1x32xf32> to vector<4x32xf32>
      %76 = arith.addf %52, %75 : vector<4x32xf32>
      %77 = arith.mulf %62, %76 : vector<4x32xf32>
      %78 = arith.addf %74, %77 : vector<4x32xf32>
      %79 = math.tanh %78 : vector<4x32xf32>
      %cst_68 = arith.constant 1.000000e+00 : f32
      %80 = vector.broadcast %cst_68 : f32 to vector<4x32xf32>
      %81 = arith.subf %80, %72 : vector<4x32xf32>
      %82 = arith.mulf %81, %79 : vector<4x32xf32>
      %83 = arith.mulf %72, %46 : vector<4x32xf32>
      %84 = arith.addf %82, %83 : vector<4x32xf32>
      %85 = vector.broadcast %41 : i32 to vector<4x1xi32>
      %86 = arith.cmpi sgt, %0, %85 : vector<4x1xi32>
      %87 = arith.extui %86 : vector<4x1xi1> to vector<4x1xi32>
      %88 = arith.sitofp %87 : vector<4x1xi32> to vector<4x1xf32>
      %89 = vector.broadcast %88 : vector<4x1xf32> to vector<4x32xf32>
      %90 = arith.mulf %89, %84 : vector<4x32xf32>
      %cst_69 = arith.constant 1.000000e+00 : f32
      %91 = vector.broadcast %cst_69 : f32 to vector<4x1xf32>
      %92 = arith.subf %91, %88 : vector<4x1xf32>
      %93 = vector.broadcast %92 : vector<4x1xf32> to vector<4x32xf32>
      %94 = arith.mulf %93, %46 : vector<4x32xf32>
      %95 = arith.addf %90, %94 : vector<4x32xf32>
      %c1_70 = arith.constant 1 : index
      %c0_71 = arith.constant 0 : index
      %c0_72 = arith.constant 0 : index
      %96 = vector.load %arg11[%c1_70, %c0_71, %c0_72] : memref<2x4x32xf32, #tpu.memory_space<vmem>>, vector<1x4x32xf32>
      %97 = vector.shape_cast %96 : vector<1x4x32xf32> to vector<4x32xf32>
      %98 = vector.shape_cast %95 : vector<4x32xf32> to vector<1x4x32xf32>
      tpu.vector_store %arg11[%c1_70, %c0_71, %c0_72], %98 {strides = array<i32>} : memref<2x4x32xf32, #tpu.memory_space<vmem>>, vector<1x4x32xf32>,
      %99 = vector.broadcast %88 : vector<4x1xf32> to vector<4x32xf32>
      %100 = arith.mulf %99, %84 : vector<4x32xf32>
      %101 = arith.index_cast %41 : i32 to index
      %c0_73 = arith.constant 0 : index
      %c0_74 = arith.constant 0 : index
      %102 = vector.load %arg10[%101, %c0_73, %c0_74] : memref<8x4x32xf32, #tpu.memory_space<vmem>>, vector<1x4x32xf32>
      %103 = vector.shape_cast %102 : vector<1x4x32xf32> to vector<4x32xf32>
      %104 = arith.addf %103, %100 : vector<4x32xf32>
      %105 = arith.index_cast %41 : i32 to index
      %c0_75 = arith.constant 0 : index
      %c0_76 = arith.constant 0 : index
      %106 = vector.load %arg10[%105, %c0_75, %c0_76] : memref<8x4x32xf32, #tpu.memory_space<vmem>>, vector<1x4x32xf32>
      %107 = vector.shape_cast %106 : vector<1x4x32xf32> to vector<4x32xf32>
      %108 = vector.shape_cast %104 : vector<4x32xf32> to vector<1x4x32xf32>
      tpu.vector_store %arg10[%105, %c0_75, %c0_76], %108 {strides = array<i32>} : memref<8x4x32xf32, #tpu.memory_space<vmem>>, vector<1x4x32xf32>,
    }
    %c8_i32_49 = arith.constant 8 : i32
    return
  }
  func.func @transform_0(%arg0: i32) -> (i32, i32, i32) {
    %c0_i32 = arith.constant 0 : i32
    %c0_i32_0 = arith.constant 0 : i32
    %c0_i32_1 = arith.constant 0 : i32
    return %c0_i32, %arg0, %c0_i32_0 : i32, i32, i32
  }
  func.func @transform_1(%arg0: i32) -> (i32, i32) {
    %c0_i32 = arith.constant 0 : i32
    %c0_i32_0 = arith.constant 0 : i32
    return %arg0, %c0_i32 : i32, i32
  }
  func.func @transform_2(%arg0: i32) -> (i32, i32, i32) {
    %c0_i32 = arith.constant 0 : i32
    %c0_i32_0 = arith.constant 0 : i32
    %c0_i32_1 = arith.constant 0 : i32
    return %c0_i32, %arg0, %c0_i32_0 : i32, i32, i32
  }
  func.func @transform_3(%arg0: i32) -> (i32, i32, i32) {
    %c0_i32 = arith.constant 0 : i32
    %c0_i32_0 = arith.constant 0 : i32
    %c0_i32_1 = arith.constant 0 : i32
    %c0_i32_2 = arith.constant 0 : i32
    return %c0_i32, %c0_i32_0, %c0_i32_1 : i32, i32, i32
  }
  func.func @transform_4(%arg0: i32) -> (i32, i32, i32) {
    %c0_i32 = arith.constant 0 : i32
    %c0_i32_0 = arith.constant 0 : i32
    %c0_i32_1 = arith.constant 0 : i32
    %c0_i32_2 = arith.constant 0 : i32
    return %c0_i32, %c0_i32_0, %c0_i32_1 : i32, i32, i32
  }
  func.func @transform_5(%arg0: i32) -> (i32, i32) {
    %c0_i32 = arith.constant 0 : i32
    %c0_i32_0 = arith.constant 0 : i32
    %c0_i32_1 = arith.constant 0 : i32
    return %c0_i32, %c0_i32_0 : i32, i32
  }
  func.func @transform_6(%arg0: i32) -> (i32, i32, i32) {
    %c0_i32 = arith.constant 0 : i32
    %c0_i32_0 = arith.constant 0 : i32
    %c0_i32_1 = arith.constant 0 : i32
    %c0_i32_2 = arith.constant 0 : i32
    return %c0_i32, %c0_i32_0, %c0_i32_1 : i32, i32, i32
  }
  func.func @transform_7(%arg0: i32) -> (i32, i32, i32) {
    %c0_i32 = arith.constant 0 : i32
    %c0_i32_0 = arith.constant 0 : i32
    %c0_i32_1 = arith.constant 0 : i32
    %c0_i32_2 = arith.constant 0 : i32
    return %c0_i32, %c0_i32_0, %c0_i32_1 : i32, i32, i32
  }
  func.func @transform_8(%arg0: i32) -> (i32, i32) {
    %c0_i32 = arith.constant 0 : i32
    %c0_i32_0 = arith.constant 0 : i32
    %c0_i32_1 = arith.constant 0 : i32
    return %c0_i32, %c0_i32_0 : i32, i32
  }
  func.func @transform_9(%arg0: i32) -> (i32, i32, i32) {
    %c0_i32 = arith.constant 0 : i32
    %c0_i32_0 = arith.constant 0 : i32
    %c0_i32_1 = arith.constant 0 : i32
    return %c0_i32, %arg0, %c0_i32_0 : i32, i32, i32
  }
  func.func @transform_10(%arg0: i32) -> (i32, i32, i32) {
    %c0_i32 = arith.constant 0 : i32
    %c0_i32_0 = arith.constant 0 : i32
    %c0_i32_1 = arith.constant 0 : i32
    return %c0_i32, %arg0, %c0_i32_0 : i32, i32, i32
  }
}

</mosaic_0001>

<bundles_post_ra>
// kernel: tpu_custom_call.1
= control target key start
LH: loop header
LB: loop body
LE: loop exit
PB: predicated region body
PF: predicated region fallthrough
CT: control target
= control target key end

     0   :  { %16 = vsyncpa [#allocation3], 0  ;;  %s1948_s0 = inlined_call_operand.hbm [shape: bf16[8,4,32], index: 0, kind: input, shape index: {}]   ;;  %s1949_s1 = inlined_call_operand.vmem [shape: s32[4,1], index: 1, kind: input, shape index: {}]   ;;  %s1950_s2 = inlined_call_operand.vmem [shape: f32[2,4,32], index: 2, kind: input, shape index: {}]   ;;  %s1951_s3 = inlined_call_operand.hbm [shape: bf16[3,32,32], index: 3, kind: input, shape index: {}]   ;;  %s1952_s4 = inlined_call_operand.hbm [shape: f32[3,32,32], index: 4, kind: input, shape index: {}]   ;;  %s1953_s5 = inlined_call_operand.vmem [shape: f32[4,32], index: 5, kind: input, shape index: {}]   ;;  %s1954_s6 = inlined_call_operand.hbm [shape: bf16[3,32,32], index: 6, kind: input, shape index: {}]   ;;  %s1955_s7 = inlined_call_operand.hbm [shape: f32[3,32,32], index: 7, kind: input, shape index: {}]   ;;  %s1956_s8 = inlined_call_operand.vmem [shape: f32[4,32], index: 8, kind: input, shape index: {}]   ;;  %s1957_s9 = inlined_call_operand.hbm [shape: f32[8,4,32], index: 9, kind: output, shape index: {0}]   ;;  %s1958_s10 = inlined_call_operand.hbm [shape: f32[2,4,32], index: 10, kind: output, shape index: {1}]  }
   0x1   :  { %17 = vsyncpa [#allocation6], 0 }
   0x2   :  { %18 = vsyncpa [#allocation9], 0 }
   0x3   :  { %19 = vsyncpa [#allocation4], 0 }
   0x4   :  { %20 = vsyncpa [#allocation13], 0  ;;  %s1525_s13 = smov [#allocation5]  }
   0x5   :  { %s42_s14 = sshll.u32 %s1525_s13, 4  ;;  %s43_s14 = int_to_ptr.vmem [resolvable:$true] %s42_s14 }
   0x6   :  { %s1367_s15 = scalar_lea.vmem %s43_s14, 768  ;;  %p1372_p1 = scmp.lt.s32.totalorder %s43_s14, %s43_s14 }
   0x7   :  { %p1368_p0 = scmp.ne.s32.totalorder %s43_s14, %s1367_s15  ;;  %p1373_p2 = scmp.lt.s32.totalorder %s1367_s15, %s1367_s15 }
   0x9   :  { %p1374_p3 = por %p1373_p2, %p1372_p1 }
   0xb   :  { %p1375_p4 = pnand %p1374_p3, %p1368_p0 }
   0xd   :  { %1378 = shalt.err (!%p1375_p4)
}
   0xe   :  { %s1526_s16 = smov 64   ;;  %s1527_s17 = smov 4  }
   0xf   :  { %48 = dma.hbm_to_vmem [thread:$0]  %s1951_s3, 768, %s43_s14, [#allocation6], %s1526_s16, %s1526_s16, %s1527_s17  }
  0x10   :  { %s1528_s20 = smov [#allocation8]   ;;  %s1529_s22 = smov [#allocation2]  }
  0x11   :  { %s68_s21 = sshll.u32 %s1528_s20, 4  ;;  %s26_s23 = sshll.u32 %s1529_s22, 4  ;;  %s69_s21 = int_to_ptr.vmem [resolvable:$true] %s68_s21  ;;  %s27_s23 = int_to_ptr.vmem [resolvable:$true] %s26_s23 }
  0x12   :  { %s1387_s24 = scalar_lea.vmem %s69_s21, 768  ;;  %p1392_p6 = scmp.lt.s32.totalorder %s69_s21, %s69_s21 }
  0x13   :  { %p1388_p5 = scmp.ne.s32.totalorder %s69_s21, %s1387_s24  ;;  %p1393_p7 = scmp.lt.s32.totalorder %s1387_s24, %s1387_s24 }
  0x15   :  { %p1394_p8 = por %p1393_p7, %p1392_p6 }
  0x17   :  { %p1395_p9 = pnand %p1394_p8, %p1388_p5 }
  0x19   :  { %1398 = shalt.err (!%p1395_p9)
}
  0x1a   :  { %74 = dma.hbm_to_vmem [thread:$0]  %s1954_s6, 768, %s69_s21, [#allocation9], %s1526_s16, %s1526_s16, %s1527_s17  }
  0x1b   :  { %s1407_s3 = scalar_lea.vmem %s27_s23, 256  ;;  %p1412_p11 = scmp.lt.s32.totalorder %s27_s23, %s27_s23 }
  0x1c   :  { %p1408_p10 = scmp.ne.s32.totalorder %s27_s23, %s1407_s3  ;;  %p1413_p12 = scmp.lt.s32.totalorder %s1407_s3, %s1407_s3 }
  0x1e   :  { %p1414_p13 = por %p1413_p12, %p1412_p11 }
  0x20   :  { %p1415_p0 = pnand %p1414_p13, %p1408_p10 }
  0x22   :  { %1418 = shalt.err (!%p1415_p0)
}
  0x23   :  { %s1530_s27 = smov 32   ;;  %s1531_s28 = smov 2  }
  0x24   :  { %32 = dma.hbm_to_vmem [thread:$0]  %s1948_s0, 256, %s27_s23, [#allocation3], %s1530_s27, %s1530_s27, %s1531_s28  }
  0x25   :  { %s1532_s11 = smov [#allocation7]  }
  0x26   :  { %s54_s12 = sshll.u32 %s1532_s11, 4  ;;  %s55_s12 = int_to_ptr.vmem [resolvable:$true] %s54_s12 }
  0x27   :  { %s1427_s13 = scalar_lea.vmem %s55_s12, 1536  ;;  %p1432_p2 = scmp.lt.s32.totalorder %s55_s12, %s55_s12 }
  0x28   :  { %p1428_p1 = scmp.ne.s32.totalorder %s55_s12, %s1427_s13  ;;  %p1433_p3 = scmp.lt.s32.totalorder %s1427_s13, %s1427_s13 }
  0x2a   :  { %p1434_p4 = por %p1433_p3, %p1432_p2 }
  0x2c   :  { %p1435_p5 = pnand %p1434_p4, %p1428_p1 }
  0x2e   :  { %1438 = shalt.err (!%p1435_p5)
}
  0x2f   :  { %s1533_s6 = smov 128   ;;  %s1534_s14 = smov 8  }
  0x30   :  { %60 = dma.hbm_to_vmem [thread:$0]  %s1952_s4, 1536, %s55_s12, [#allocation6], %s1533_s6, %s1533_s6, %s1534_s14  }
  0x31   :  { %s1535_s19 = smov [#allocation10]  }
  0x32   :  { %s80_s20 = sshll.u32 %s1535_s19, 4  ;;  %s81_s20 = int_to_ptr.vmem [resolvable:$true] %s80_s20 }
  0x33   :  { %s1447_s0 = scalar_lea.vmem %s81_s20, 1536  ;;  %p1452_p7 = scmp.lt.s32.totalorder %s81_s20, %s81_s20 }
  0x34   :  { %p1448_p6 = scmp.ne.s32.totalorder %s81_s20, %s1447_s0  ;;  %p1453_p8 = scmp.lt.s32.totalorder %s1447_s0, %s1447_s0 }
  0x36   :  { %p1454_p9 = por %p1453_p8, %p1452_p7 }
  0x38   :  { %p1455_p10 = pnand %p1454_p9, %p1448_p6 }
  0x3a   :  { %1458 = shalt.err (!%p1455_p10)
}
  0x3b   :  { %86 = dma.hbm_to_vmem [thread:$0]  %s1955_s7, 1536, %s81_s20, [#allocation9], %s1533_s6, %s1533_s6, %s1534_s14  }
  0x3c   :  { %1507 = dma.done.wait [#allocation3], 256  }
  0x3d   :  { %1508 = vsyncadd [#allocation3], 4294967040 }
  0x3e   :  { %1509 = dma.done.wait [#allocation6], 2304  }
  0x3f   :  { %1510 = vsyncadd [#allocation6], 4294964992 }
  0x40   :  { %1511 = dma.done.wait [#allocation9], 2304  }
  0x41   :  { %1512 = vsyncadd [#allocation9], 4294964992  ;;  %v1623_v0 = vld [vmem:[%s1949_s1] sm:$0xf]  ;;  %v1625_v1 = vld [vmem:[#allocation5] sm:$0xf] }
  0x42   :  { %v1627_v2 = vld [vmem:[#allocation5 + $0x4] sm:$0xf]  ;;  %v1629_v3 = vld [vmem:[#allocation5 + $0x8] sm:$0xf]  ;;  %v1631_v4 = vld [vmem:[#allocation5 + $0xc] sm:$0xf] }
  0x43   :  { %v1633_v5 = vld [vmem:[#allocation5 + $0x10] sm:$0xf]  ;;  %v1635_v6 = vld [vmem:[#allocation5 + $0x14] sm:$0xf]  ;;  %v1637_v7 = vld [vmem:[#allocation5 + $0x18] sm:$0xf] }
  0x44   :  { %v1639_v8 = vld [vmem:[#allocation5 + $0x1c] sm:$0xf]  ;;  %v1641_v9 = vld [vmem:[#allocation5 + $0x20] sm:$0xf]  ;;  %v1643_v10 = vld [vmem:[#allocation5 + $0x24] sm:$0xf] }
  0x45   :  { %v1645_v11 = vld [vmem:[#allocation5 + $0x28] sm:$0xf]  ;;  %v1647_v12 = vld [vmem:[#allocation5 + $0x2c] sm:$0xf]  ;;  %v1649_v13 = vld [vmem:[#allocation7] sm:$0xff]  ;;  %vm108_vm0 = vcmask 257024  }
  0x46   :  { %v1651_v14 = vld [vmem:[#allocation7 + $0x8] sm:$0xff]  ;;  %v1653_v15 = vld [vmem:[#allocation7 + $0x10] sm:$0xff]  ;;  %v1655_v16 = vld [vmem:[#allocation7 + $0x18] sm:$0xff]  ;;  %s1686_s27 = smov 0  }
  0x47   :  { %v1657_v17 = vld [vmem:[#allocation7 + $0x20] sm:$0xff]  ;;  %v1659_v18 = vld [vmem:[#allocation7 + $0x28] sm:$0xff]  ;;  %v1661_v19 = vld [vmem:[#allocation7 + $0x30] sm:$0xff] }
  0x48   :  { %v1663_v20 = vld [vmem:[#allocation7 + $0x38] sm:$0xff]  ;;  %v1665_v21 = vld [vmem:[#allocation7 + $0x40] sm:$0xff]  ;;  %v1667_v22 = vld [vmem:[#allocation7 + $0x48] sm:$0xff] }
  0x49   :  { %v1669_v23 = vld [vmem:[#allocation7 + $0x50] sm:$0xff]  ;;  %v1671_v24 = vld [vmem:[#allocation7 + $0x58] sm:$0xff]  ;;  %v1676_v25 = vld [vmem:[%s1953_s5] sm:$0xf] }
  0x4a   :  { %v106_v26 = vld [vmem:[%s1950_s2] sm:$0xf]  ;;  %v107_v27 = vld [vmem:[%s1950_s2 + $0x4] sm:$0xf] }
  0x4b   :  { %109 = vst.msk [vmem:[#allocation12] sm:$0xf] %vm108_vm0, %v106_v26  ;;  %110 = vst.msk [vmem:[#allocation12 + $0x4] sm:$0xf] %vm108_vm0, %v107_v27 }
  0x4c LB: > { %v1536_v28 = vmov 0.0   ;;  %vm1537_vm1 = vmmov 0   ;;  %vm150_vm2 = vcmask 261120   ;;  %v1114_v30 = vcombine.low %v1629_v3, %v1631_v4  ;;  %s1110_s2 = sshll.u32 %s1519_s27, 1  ;;  %s1124_s28 = sshll.u32 %s1519_s27, 2  ;;  %s1519_s27 = sphi %s1686_s27, %s145_s27  }
  0x4d   : > { %1188 = vmatprep.subr.mxu0 %v1536_v28  ;;  %1196 = vmatprep.mubr.msk.f32.mxu0 %vm1537_vm1, %v1536_v28  ;;  %v560_v31 = vstv %s1519_s27  ;;  %v1113_v32 = vcombine.low %v1625_v1, %v1627_v2  ;;  %v1117_v33 = vcombine.low %v1637_v7, %v1639_v8  ;;  %v1538_v34 = vmov 0   ;;  %s147_s5 = scalar_lea.vmem [#allocation2], %s1110_s2  ;;  %s580_s29 = scalar_lea.vmem [#allocation11], %s1124_s28 }
  0x4e   : > { %1189 = vmatpush3.msra.mxu0 %v1655_v16  ;;  %1199 = vmatprep.subr.mxu1 %v1536_v28  ;;  %vm561_vm3 = vcmp.gt.s32.totalorder %v1623_v0, %v560_v31  ;;  %v148_v36 = vld [vmem:[%s147_s5] sm:$0x3]  ;;  %v1116_v37 = vcombine.low %v1633_v5, %v1635_v6  ;;  %v1120_v38 = vcombine.low %v1645_v11, %v1647_v12  ;;  %v349_v41 = vlaneseq  ;;  %s145_s27 = sadd.s32 1, %s1519_s27  }
  0x4f   : > { %1190 = vmatprep.subr.mxu0 %v1536_v28  ;;  %1200 = vmatpush3.msra.mxu1 %v1663_v20  ;;  %v1123_v35 = vsel %vm561_vm3, 1.0, %v1536_v28  ;;  %v1119_v40 = vcombine.low %v1641_v9, %v1643_v10  ;;  %p142_p11 = scmp.ge.s32.totalorder %s145_s27, 8  }
  0x50   : > { %1191 = vmatpush3.msra.mxu0 %v1653_v15  ;;  %1201 = vmatprep.subr.mxu1 %v1536_v28  ;;  %v570_v39 = vsub.f32 1.0, %v1123_v35  ;;  %v1760_v42 = vshrl.u32 %v349_v41, 7  ;;  %v1806_v1 = vld [vmem:[#allocation8 + $0x28] sm:$0xf] (%p142_p11)  ;;  %v1808_v2 = vld [vmem:[#allocation8 + $0x2c] sm:$0xf] (%p142_p11) }
  0x51   : > { %1192 = vmatprep.subr.mxu0 %v1536_v28  ;;  %1202 = vmatpush3.msra.mxu1 %v1661_v19  ;;  %v1810_v3 = vld [vmem:[#allocation10] sm:$0xff] (%p142_p11)  ;;  %v1812_v4 = vld [vmem:[#allocation10 + $0x8] sm:$0xff] (%p142_p11)  ;;  %v1814_v5 = vld [vmem:[#allocation10 + $0x10] sm:$0xff] (%p142_p11)  ;;  %s1839_s12 = smov (%p142_p11), 0  }
  0x52   : > { %1193 = vmatpush3.msra.mxu0 %v1651_v14  ;;  %v1703_v29 = vld [vmem:[#allocation12] sm:$0xf]  ;;  %1203 = vmatprep.subr.mxu1 %v1536_v28  ;;  %v351_v45 = vsub.s32 0, %v1760_v42  ;;  %v414_v49 = vsub.s32 1, %v1760_v42  ;;  %v1816_v6 = vld [vmem:[#allocation10 + $0x18] sm:$0xff] (%p142_p11)  ;;  %v1820_v8 = vld [vmem:[#allocation10 + $0x28] sm:$0xff] (%p142_p11) }
  0x53   : > { %1194 = vmatprep.subr.mxu0 %v1536_v28  ;;  %1204 = vmatpush3.msra.mxu1 %v1659_v18  ;;  %v1818_v7 = vld [vmem:[#allocation10 + $0x20] sm:$0xff] (%p142_p11)  ;;  %v1822_v9 = vld [vmem:[#allocation10 + $0x30] sm:$0xff] (%p142_p11)  ;;  %v1824_v10 = vld [vmem:[#allocation10 + $0x38] sm:$0xff] (%p142_p11) }
  0x54   : > { %1195 = vmatpush3.msra.mxu0 %v1649_v13  ;;  %1205 = vmatprep.subr.mxu1 %v1536_v28  ;;  %v352_v48 = vrot.slane %v1676_v25, %v351_v45  ;;  %v415_v54 = vrot.slane %v1676_v25, %v414_v49  ;;  %v1826_v11 = vld [vmem:[#allocation10 + $0x40] sm:$0xff] (%p142_p11)  ;;  %v1828_v12 = vld [vmem:[#allocation10 + $0x48] sm:$0xff] (%p142_p11)  ;;  %v1830_v13 = vld [vmem:[#allocation10 + $0x50] sm:$0xff] (%p142_p11) }
  0x55   : > { %1197 = vmatmul.mubr.msk.f32.vlgmr.msra.gmra.mxu0 %vm150_vm2, %v1703_v29  ;;  %1210 = vmatprep.subr.bf16.mxu0 %v1536_v28  ;;  %v1832_v14 = vld [vmem:[#allocation10 + $0x58] sm:$0xff] (%p142_p11)  ;;  %v1837_v15 = vld [vmem:[%s1956_s8] sm:$0xf] (%p142_p11) }
  0x56   : > { %1211 = vmatpush3.bf16.msra.mxu0 %v1114_v30  ;;  %1214 = vmatprep.mubr.msk.bf16.mxu0 %vm1537_vm1, %v1536_v28 }
  0x57   : > { %1212 = vmatprep.subr.bf16.mxu0 %v1536_v28  ;;  %1206 = vmatpush3.msra.mxu1 %v1657_v17 }
  0x58   : > { %1207 = vmatprep.mubr.msk.f32.mxu1 %vm1537_vm1, %v1536_v28  ;;  %1218 = vmatprep.subr.bf16.mxu1 %v1536_v28 }
  0x59   : > { %1208 = vmatmul.mubr.msk.f32.vlgmr.msra.gmra.mxu1 %vm150_vm2, %v1703_v29  ;;  %1337 = vset.pattern.permute.xlu0 %v1538_v34 }
  0x5a   : > { %1213 = vmatpush3.bf16.msra.mxu0 %v1113_v32  ;;  %1219 = vmatpush3.bf16.msra.mxu1 %v1117_v33 }
  0x5b   : > { %1220 = vmatprep.subr.bf16.mxu1 %v1536_v28  ;;  %1222 = vmatprep.mubr.msk.bf16.mxu1 %vm1537_vm1, %v1536_v28 }
  0x5c   : > { %1226 = vmatprep.subr.bf16.mxu0 %v1536_v28  ;;  %566 = vperm.xlu0 %1337, %v1123_v35  }
  0x5d   : > { %1215 = vmatmul.mubr.msk.bf16.vlgmr.msra.gmra.mxu0 %vm150_vm2, %v148_v36 }
  0x5e   : > { %1221 = vmatpush3.bf16.msra.mxu1 %v1116_v37  ;;  %1227 = vmatpush3.bf16.msra.mxu0 %v1120_v38  ;;  %v481_v38 = vsub.s32 3, %v1760_v42 }
  0x5f   : > { %1234 = vmatprep.subr.mxu1 %v1536_v28  ;;  %1228 = vmatprep.subr.bf16.mxu0 %v1536_v28 }
  0x60   : > { %1230 = vmatprep.mubr.msk.bf16.mxu0 %vm1537_vm1, %v1536_v28  ;;  %573 = vperm.xlu0 %1337, %v570_v39   ;;  %v425_v39 = vsub.s32 2, %v1760_v42 }
  0x61   : > { %1223 = vmatmul.mubr.msk.bf16.vlgmr.msra.gmra.mxu1 %vm150_vm2, %v148_v36 }
  0x62   : > { %1235 = vmatpush3.msra.mxu1 %v1671_v24  ;;  %1229 = vmatpush3.bf16.msra.mxu0 %v1119_v40  ;;  %v482_v40 = vrot.slane %v1676_v25, %v481_v38 }
  0x63   : > { %1236 = vmatprep.subr.mxu1 %v1536_v28  ;;  %1242 = vmatprep.mubr.msk.f32.mxu1 %vm1537_vm1, %v1536_v28 }
  0x64   : > { %1237 = vmatpush3.msra.mxu1 %v1669_v23 }
  0x65   : > { %1238 = vmatprep.subr.mxu1 %v1536_v28  ;;  %1231 = vmatmul.mubr.msk.bf16.vlgmr.msra.gmra.mxu0 %vm150_vm2, %v148_v36 }
  0x66   : > { %1239 = vmatpush3.msra.mxu1 %v1667_v22 }
  0x67   : > { %1240 = vmatprep.subr.mxu1 %v1536_v28 }
  0x68   : > { %1241 = vmatpush3.msra.mxu1 %v1665_v21 }
  0x69   : > { %1243 = vmatmul.mubr.msk.f32.vlgmr.msra.gmra.mxu1 %vm150_vm2, %v1703_v29 }
 0x115   : > { %v220_v43 = vpop.f32.mrf.mxu0 }
 0x117   : > { %v1198_v44 = vpop.f32.mrf.mxu0 }
 0x119   : > { %v290_v46 = vpop.f32.mrf.mxu1 }
 0x11b   : > { %v1209_v47 = vpop.f32.mrf.mxu1 }
 0x11d   : > { %v343_v50 = vpop.f32.mrf.mxu0 }
 0x11e   : > { %v344_v51 = vadd.f32 %v343_v50, %v220_v43  ;;  %v426_v43 = vrot.slane %v1676_v25, %v425_v39 }
 0x11f   : > { %v1216_v52 = vpop.f32.mrf.mxu0 }
 0x120   : > { %v353_v53 = vadd.f32 %v352_v48, %v344_v51 }
 0x121   : > { %v346_v55 = vpop.f32.mrf.mxu0  ;;  %v406_v56 = vpop.f32.mrf.mxu1 }
 0x122   : > { %v354_v57 = vsub.f32 0.0, %v353_v53  ;;  %v407_v58 = vadd.f32 %v406_v56, %v290_v46  ;;  %v567_v53 = vpop.permute.xlu0 %566 }
 0x123   : > { %v1217_v59 = vpop.f32.mrf.mxu0  ;;  %v1224_v60 = vpop.f32.mrf.mxu1 }
 0x124   : > { %v355_v61 = vmul.f32 1.442695, %v354_v57  ;;  %v416_v62 = vadd.f32 %v415_v54, %v407_v58 }
 0x125   : > { %v409_v63 = vpop.f32.mrf.mxu1  ;;  %v473_v26 = vpop.f32.mrf.mxu0 }
 0x126   : > { %1338 = vpow2.f32 %v355_v61  ;;  %v417_v30 = vsub.f32 0.0, %v416_v62  ;;  %v474_v47 = vadd.f32 %v473_v26, %v426_v43  ;;  %v574_v58 = vpop.permute.xlu0 %573  ;;  %v1786_v63 = vld [vmem:[#allocation8] sm:$0xf] (%p142_p11)  ;;  %v1788_v26 = vld [vmem:[#allocation8 + $0x4] sm:$0xf] (%p142_p11) }
 0x127   : > { %v1225_v27 = vpop.f32.mrf.mxu1  ;;  %v1232_v28 = vpop.f32.mrf.mxu0  ;;  %v576_v61 = vmul.f32 %v574_v58, %v1703_v29 }
 0x128   : > { %v418_v35 = vmul.f32 1.442695, %v417_v30  ;;  %v1790_v27 = vld [vmem:[#allocation8 + $0x8] sm:$0xf] (%p142_p11)  ;;  %v1792_v28 = vld [vmem:[#allocation8 + $0xc] sm:$0xf] (%p142_p11) }
 0x129   : > { %v549_v31 = vpop.f32.mrf.mxu1  ;;  %v476_v32 = vpop.f32.mrf.mxu0  ;;  %v1796_v30 = vld [vmem:[#allocation8 + $0x14] sm:$0xf] (%p142_p11) }
 0x12a   : > { %1340 = vpow2.f32 %v418_v35  ;;  %v550_v46 = vadd.f32 %v549_v31, %v482_v40  ;;  %v1798_v31 = vld [vmem:[#allocation8 + $0x18] sm:$0xf] (%p142_p11)  ;;  %v1800_v32 = vld [vmem:[#allocation8 + $0x1c] sm:$0xf] (%p142_p11) }
 0x12b   : > { %v1244_v33 = vpop.f32.mrf.mxu1  ;;  %v1233_v34 = vpop.f32.mrf.mxu0 }
 0x12c   :  { %v1802_v33 = vld [vmem:[#allocation8 + $0x20] sm:$0xf] (%p142_p11)  ;;  %v1804_v34 = vld [vmem:[#allocation8 + $0x24] sm:$0xf] (%p142_p11) }
 0x133   : > { %v1339_v36 = vpop.eup %1338 }
 0x134   : > { %v357_v37 = vadd.f32 1.0, %v1339_v36 }
 0x136   : > { %1342 = vrcp.f32 %v357_v37 }
 0x137   : > { %v1341_v41 = vpop.eup %1340 }
 0x138   : > { %v420_v44 = vadd.f32 1.0, %v1341_v41 }
 0x13a   : > { %1344 = vrcp.f32 %v420_v44 }
 0x143   : > { %v1343_v48 = vpop.eup %1342 }
 0x144   : > { %v553_v50 = vmul.f32 %v1343_v48, %v550_v46 }
 0x146   : > { %v554_v51 = vadd.f32 %v553_v50, %v474_v47 }
 0x147   : > { %v1345_v52 = vpop.eup %1344 }
 0x148   : > { %1346 = vtanh.f32 %v554_v51  ;;  %v556_v54 = vsub.f32 1.0, %v1345_v52  ;;  %v558_v57 = vmul.f32 %v1345_v52, %v1703_v29  ;;  %v1794_v29 = vld [vmem:[#allocation8 + $0x10] sm:$0xf] (%p142_p11) }
 0x155   : > { %v1347_v55 = vpop.eup %1346 }
 0x156   : > { %v557_v56 = vmul.f32 %v1347_v55, %v556_v54 }
 0x158   : > { %v559_v59 = vadd.f32 %v558_v57, %v557_v56 }
 0x15a   : > { %v569_v60 = vmul.f32 %v567_v53, %v559_v59  ;;  %144 = sbr.rel (!%p142_p11) target bundleno = 76 (0x4c), region = 111 }
 0x15c   : > { %581 = vst.msk [vmem:[%s580_s29] sm:$0xf] %vm108_vm0, %v569_v60  ;;  %v577_v62 = vadd.f32 %v576_v61, %v569_v60 }
 0x15e   : > { %578 = vst.msk [vmem:[#allocation12] sm:$0xf] %vm108_vm0, %v577_v62 }
 0x15f LB: > { %v1539_v16 = vmov 0.0   ;;  %vm1540_vm4 = vmmov 0   ;;  %s1856_s8 = ssub.s32 7, %s1523_s12  ;;  %v1859_v17 = vld [vmem:[#allocation12 + $0x4] sm:$0xf]  ;;  %v1129_v18 = vcombine.low %v1790_v27, %v1792_v28  ;;  %v1128_v20 = vcombine.low %v1786_v63, %v1788_v26  ;;  %s616_s12 = sadd.s32 1, %s1523_s12   ;;  %s1523_s12 = sphi %s1839_s12, %s616_s12  }
 0x160   : > { %1245 = vmatprep.subr.mxu0 %v1539_v16  ;;  %1253 = vmatprep.mubr.msk.f32.mxu0 %vm1540_vm4, %v1539_v16  ;;  %v1033_v19 = vstv %s1856_s8  ;;  %s1125_s13 = sshll.u32 %s1856_s8, 1  ;;  %v1132_v21 = vcombine.low %v1798_v31, %v1800_v32  ;;  %v1541_v22 = vmov 0   ;;  %v1131_v25 = vcombine.low %v1794_v29, %v1796_v30  ;;  %s1139_s14 = sshll.u32 %s1856_s8, 2 }
 0x161   : > { %1246 = vmatpush3.msra.mxu0 %v1816_v6  ;;  %1256 = vmatprep.subr.mxu1 %v1539_v16  ;;  %vm1034_vm5 = vcmp.gt.s32.totalorder %v1623_v0, %v1033_v19  ;;  %s619_s6 = scalar_lea.vmem [#allocation2], %s1125_s13  ;;  %v1135_v35 = vcombine.low %v1806_v1, %v1808_v2  ;;  %v1134_v37 = vcombine.low %v1802_v33, %v1804_v34  ;;  %s1053_s15 = scalar_lea.vmem [#allocation11], %s1139_s14 }
 0x162   : > { %1247 = vmatprep.subr.mxu0 %v1539_v16  ;;  %1257 = vmatpush3.msra.mxu1 %v1824_v10  ;;  %v1138_v23 = vsel %vm1034_vm5, 1.0, %v1539_v16  ;;  %v620_v24 = vld [vmem:[%s619_s6] sm:$0x3]  ;;  %v825_v46 = vrot.slane %v1837_v15, %v351_v45  ;;  %v888_v52 = vrot.slane %v1837_v15, %v414_v49  ;;  %p613_p12 = scmp.ge.s32.totalorder %s616_s12, 8  }
 0x163   : > { %1248 = vmatpush3.msra.mxu0 %v1814_v5  ;;  %1258 = vmatprep.subr.mxu1 %v1539_v16  ;;  %v1043_v36 = vsub.f32 1.0, %v1138_v23  ;;  %s1542_s18 = smov (%p613_p12), [#allocation11]   ;;  %s1543_s20 = smov (%p613_p12), [#allocation12]  }
 0x164   : > { %1249 = vmatprep.subr.mxu0 %v1539_v16  ;;  %1259 = vmatpush3.msra.mxu1 %v1822_v9  ;;  %s1062_s19 = sshll.u32 (%p613_p12), %s1542_s18, 4  ;;  %s1074_s0 = sshll.u32 (%p613_p12), %s1543_s20, 4  ;;  %s1063_s19 = int_to_ptr.vmem [resolvable:$true] %s1062_s19  ;;  %s1075_s0 = int_to_ptr.vmem [resolvable:$true] %s1074_s0 }
 0x165   : > { %1250 = vmatpush3.msra.mxu0 %v1812_v4  ;;  %1260 = vmatprep.subr.mxu1 %v1539_v16  ;;  %s1459_s21 = scalar_lea.vmem (%p613_p12), %s1063_s19, 512  ;;  %p1464_p0 = scmp.lt.s32.totalorder (%p613_p12), %s1063_s19, %s1063_s19 }
 0x166   : > { %1251 = vmatprep.subr.mxu0 %v1539_v16  ;;  %1261 = vmatpush3.msra.mxu1 %v1820_v8  ;;  %p1460_p13 = scmp.ne.s32.totalorder (%p613_p12), %s1063_s19, %s1459_s21  ;;  %p1465_p1 = scmp.lt.s32.totalorder (%p613_p12), %s1459_s21, %s1459_s21 }
 0x167   : > { %1252 = vmatpush3.msra.mxu0 %v1810_v3  ;;  %1262 = vmatprep.subr.mxu1 %v1539_v16 }
 0x168   : > { %1254 = vmatmul.mubr.msk.f32.vlgmr.msra.gmra.mxu0 %vm150_vm2, %v1859_v17  ;;  %1267 = vmatprep.subr.bf16.mxu0 %v1539_v16  ;;  %p1466_p2 = por (%p613_p12), %p1465_p1, %p1464_p0 }
 0x169   : > { %1268 = vmatpush3.bf16.msra.mxu0 %v1129_v18  ;;  %1271 = vmatprep.mubr.msk.bf16.mxu0 %vm1540_vm4, %v1539_v16 }
 0x16a   : > { %1269 = vmatprep.subr.bf16.mxu0 %v1539_v16  ;;  %1263 = vmatpush3.msra.mxu1 %v1818_v7  ;;  %p1467_p3 = pnand (%p613_p12), %p1466_p2, %p1460_p13 }
 0x16b   : > { %1264 = vmatprep.mubr.msk.f32.mxu1 %vm1540_vm4, %v1539_v16  ;;  %1275 = vmatprep.subr.bf16.mxu1 %v1539_v16 }
 0x16c   : > { %1265 = vmatmul.mubr.msk.f32.vlgmr.msra.gmra.mxu1 %vm150_vm2, %v1859_v17  ;;  %1348 = vset.pattern.permute.xlu0 %v1541_v22 }
 0x16d   : > { %1270 = vmatpush3.bf16.msra.mxu0 %v1128_v20  ;;  %1276 = vmatpush3.bf16.msra.mxu1 %v1132_v21 }
 0x16e   : > { %1277 = vmatprep.subr.bf16.mxu1 %v1539_v16  ;;  %1279 = vmatprep.mubr.msk.bf16.mxu1 %vm1540_vm4, %v1539_v16 }
 0x16f   : > { %1283 = vmatprep.subr.bf16.mxu0 %v1539_v16  ;;  %1039 = vperm.xlu0 %1348, %v1138_v23  }
 0x170   : > { %1272 = vmatmul.mubr.msk.bf16.vlgmr.msra.gmra.mxu0 %vm150_vm2, %v620_v24 }
 0x171   : > { %1278 = vmatpush3.bf16.msra.mxu1 %v1131_v25  ;;  %1284 = vmatpush3.bf16.msra.mxu0 %v1135_v35 }
 0x172   : > { %1291 = vmatprep.subr.mxu1 %v1539_v16  ;;  %1285 = vmatprep.subr.bf16.mxu0 %v1539_v16 }
 0x173   : > { %1287 = vmatprep.mubr.msk.bf16.mxu0 %vm1540_vm4, %v1539_v16  ;;  %1046 = vperm.xlu0 %1348, %v1043_v36   ;;  %v955_v36 = vrot.slane %v1837_v15, %v481_v38 }
 0x174   : > { %1280 = vmatmul.mubr.msk.bf16.vlgmr.msra.gmra.mxu1 %vm150_vm2, %v620_v24 }
 0x175   : > { %1292 = vmatpush3.msra.mxu1 %v1832_v14  ;;  %1286 = vmatpush3.bf16.msra.mxu0 %v1134_v37 }
 0x176   : > { %1293 = vmatprep.subr.mxu1 %v1539_v16  ;;  %1299 = vmatprep.mubr.msk.f32.mxu1 %vm1540_vm4, %v1539_v16 }
 0x177   : > { %1294 = vmatpush3.msra.mxu1 %v1830_v13 }
 0x178   : > { %1295 = vmatprep.subr.mxu1 %v1539_v16  ;;  %1288 = vmatmul.mubr.msk.bf16.vlgmr.msra.gmra.mxu0 %vm150_vm2, %v620_v24 }
 0x179   : > { %1296 = vmatpush3.msra.mxu1 %v1828_v12 }
 0x17a   : > { %1297 = vmatprep.subr.mxu1 %v1539_v16 }
 0x17b   : > { %1298 = vmatpush3.msra.mxu1 %v1826_v11 }
 0x17c   : > { %1300 = vmatmul.mubr.msk.f32.vlgmr.msra.gmra.mxu1 %vm150_vm2, %v1859_v17 }
 0x228   : > { %v693_v40 = vpop.f32.mrf.mxu0 }
 0x22a   : > { %v1255_v41 = vpop.f32.mrf.mxu0 }
 0x22c   : > { %v763_v43 = vpop.f32.mrf.mxu1 }
 0x22e   : > { %v1266_v44 = vpop.f32.mrf.mxu1 }
 0x230   : > { %v816_v47 = vpop.f32.mrf.mxu0 }
 0x231   : > { %v817_v48 = vadd.f32 %v816_v47, %v693_v40  ;;  %v899_v40 = vrot.slane %v1837_v15, %v425_v39 }
 0x232   : > { %v1273_v50 = vpop.f32.mrf.mxu0 }
 0x233   : > { %v826_v51 = vadd.f32 %v825_v46, %v817_v48 }
 0x234   : > { %v819_v53 = vpop.f32.mrf.mxu0  ;;  %v879_v54 = vpop.f32.mrf.mxu1 }
 0x235   : > { %v827_v55 = vsub.f32 0.0, %v826_v51  ;;  %v880_v56 = vadd.f32 %v879_v54, %v763_v43  ;;  %v1040_v51 = vpop.permute.xlu0 %1039 }
 0x236   : > { %v1274_v57 = vpop.f32.mrf.mxu0  ;;  %v1281_v58 = vpop.f32.mrf.mxu1 }
 0x237   : > { %v828_v59 = vmul.f32 1.442695, %v827_v55  ;;  %v889_v60 = vadd.f32 %v888_v52, %v880_v56  ;;  %v1054_v58 = vld [vmem:[%s1053_s15] sm:$0xf] }
 0x238   : > { %v882_v61 = vpop.f32.mrf.mxu1  ;;  %v946_v62 = vpop.f32.mrf.mxu0 }
 0x239   : > { %1349 = vpow2.f32 %v828_v59  ;;  %v890_v19 = vsub.f32 0.0, %v889_v60  ;;  %v947_v44 = vadd.f32 %v946_v62, %v899_v40  ;;  %v1047_v56 = vpop.permute.xlu0 %1046 }
 0x23a   : > { %v1282_v16 = vpop.f32.mrf.mxu1  ;;  %v1289_v18 = vpop.f32.mrf.mxu0  ;;  %v1049_v60 = vmul.f32 %v1047_v56, %v1859_v17 }
 0x23b   : > { %v891_v24 = vmul.f32 1.442695, %v890_v19 }
 0x23c   : > { %v1022_v20 = vpop.f32.mrf.mxu1  ;;  %v949_v21 = vpop.f32.mrf.mxu0 }
 0x23d   : > { %1351 = vpow2.f32 %v891_v24  ;;  %v1023_v43 = vadd.f32 %v1022_v20, %v955_v36 }
 0x23e   : > { %v1301_v22 = vpop.f32.mrf.mxu1  ;;  %v1290_v23 = vpop.f32.mrf.mxu0 }
 0x246   : > { %v1350_v25 = vpop.eup %1349 }
 0x247   : > { %v830_v35 = vadd.f32 1.0, %v1350_v25 }
 0x249   : > { %1353 = vrcp.f32 %v830_v35 }
 0x24a   : > { %v1352_v37 = vpop.eup %1351 }
 0x24b   : > { %v893_v41 = vadd.f32 1.0, %v1352_v37 }
 0x24d   : > { %1355 = vrcp.f32 %v893_v41 }
 0x256   : > { %v1354_v46 = vpop.eup %1353 }
 0x257   : > { %v1026_v47 = vmul.f32 %v1354_v46, %v1023_v43 }
 0x259   : > { %v1027_v48 = vadd.f32 %v1026_v47, %v947_v44 }
 0x25a   : > { %v1356_v50 = vpop.eup %1355 }
 0x25b   : > { %1357 = vtanh.f32 %v1027_v48  ;;  %v1029_v52 = vsub.f32 1.0, %v1356_v50  ;;  %v1031_v55 = vmul.f32 %v1356_v50, %v1859_v17 }
 0x268   : > { %v1358_v53 = vpop.eup %1357 }
 0x269   : > { %v1030_v54 = vmul.f32 %v1358_v53, %v1029_v52 }
 0x26b   : > { %v1032_v57 = vadd.f32 %v1031_v55, %v1030_v54 }
 0x26d   : > { %v1042_v59 = vmul.f32 %v1040_v51, %v1032_v57  ;;  %615 = sbr.rel (!%p613_p12) target bundleno = 351 (0x15f), region = 122 }
 0x26f   : > { %v1055_v61 = vadd.f32 %v1054_v58, %v1042_v59  ;;  %v1050_v62 = vadd.f32 %v1049_v60, %v1042_v59 }
 0x271   : > { %1056 = vst.msk [vmem:[%s1053_s15] sm:$0xf] %vm108_vm0, %v1055_v61  ;;  %1051 = vst.msk [vmem:[#allocation12 + $0x4] sm:$0xf] %vm108_vm0, %v1050_v62 }
 0x272   :  { %1470 = shalt.err (!%p1467_p3)
}
 0x273   :  { %1068 = dma.vmem_to_hbm [thread:$0]  %s1063_s19, 512, %s1957_s9, [#allocation4], %s1526_s16, %s1526_s16, %s1527_s17  }
 0x274   :  { %s1479_s23 = scalar_lea.vmem %s1075_s0, 128  ;;  %p1484_p5 = scmp.lt.s32.totalorder %s1075_s0, %s1075_s0 }
 0x275   :  { %p1480_p4 = scmp.ne.s32.totalorder %s1075_s0, %s1479_s23  ;;  %p1485_p6 = scmp.lt.s32.totalorder %s1479_s23, %s1479_s23 }
 0x277   :  { %p1486_p7 = por %p1485_p6, %p1484_p5 }
 0x279   :  { %p1487_p8 = pnand %p1486_p7, %p1480_p4 }
 0x27b   :  { %1490 = shalt.err (!%p1487_p8)
}
 0x27c   :  { %1080 = dma.vmem_to_hbm [thread:$0]  %s1075_s0, 128, %s1958_s10, [#allocation13], %s1526_s16, %s1526_s16, %s1527_s17  }
 0x27d   :  { %1513 = dma.done.wait [#allocation4], 512  }
 0x27e   :  { %1514 = vsyncadd [#allocation4], 4294966784 }
 0x27f   :  { %1515 = dma.done.wait [#allocation13], 128  }
 0x280   :  { %1516 = vsyncadd [#allocation13], 4294967168 }
 0x281   :  { %1087 = vsyncpa [#allocation3], 1 }
 0x282   :  { %1088 = vsyncpa [#allocation6], 1 }
 0x283   :  { %1089 = vsyncpa [#allocation9], 1 }
 0x284   :  { %1090 = vsyncpa [#allocation4], 1 }
 0x285   :  { %1091 = vsyncpa [#allocation13], 1 }

</bundles_post_ra>
